<compile_context>
chip_gen: v5e
topology: v5e:2x2
jax: 0.10.0
libtpu: 0.0.40
codegen_flags: <defaults>
</compile_context>

<pallas_src>
import functools

import jax
import jax.numpy as jnp
import numpy as np
from jax.experimental import pallas as pl
from jax.experimental.pallas import tpu as pltpu

GAMMA = 2
IGNORE_INDEX = 255


def _round_up(a, b):
    return -(-a // b) * b


def _focal_loss_kernel(logits_ref, target_ref, out_ref, acc_ref, *,
                       num_classes, gamma, gamma_int, ignore_index):
    j = pl.program_id(1)

    @pl.when(j == 0)
    def _():
        acc_ref[...] = jnp.zeros_like(acc_ref)

    xb = logits_ref[...][0].astype(jnp.float32)   # (C, t_sub, 128)
    t = target_ref[...][0, 0]                     # (t_sub, 128) int32

    if num_classes <= 64:
        # Unrolled fold over the (small, leading) class axis: pure VPU
        # elementwise work, no cross-lane reduction, no iota gather.
        m = xb[0]
        for c in range(1, num_classes):
            m = jnp.maximum(m, xb[c])
        s = jnp.exp(xb[0] - m)
        tgt = jnp.where(t == 0, xb[0], 0.0)
        for c in range(1, num_classes):
            xc = xb[c]
            s = s + jnp.exp(xc - m)
            tgt = tgt + jnp.where(t == c, xc, 0.0)
    else:
        # Large class counts: reductions over the leading (vreg-major) axis
        # are still elementwise vreg combines (VPU), and keep trace size small.
        m = jnp.max(xb, axis=0)
        e = jnp.exp(xb - m[None, :, :])
        s = jnp.sum(e, axis=0)
        cls = jax.lax.broadcasted_iota(jnp.int32, xb.shape, 0)
        tgt = jnp.sum(jnp.where(cls == t[None, :, :], xb, 0.0), axis=0)

    lse = m + jnp.log(s)                          # (t_sub, 128)
    logpt = lse - tgt                             # = -log p_target
    logpt = jnp.where(t != ignore_index, logpt, 0.0)   # ignored pixels -> 0 loss
    pt = jnp.exp(-logpt)
    u = 1.0 - pt

    if gamma_int is not None:
        focal = jnp.ones_like(u) if gamma_int == 0 else u
        for _ in range(max(gamma_int - 1, 0)):
            focal = focal * u                     # repeated VPU multiply, no pow
    else:
        # general (non-integer) gamma: clamp avoids NaN from fp jitter near 0
        focal = jnp.power(jnp.maximum(u, 0.0), gamma)

    loss = focal * logpt                          # (t_sub, 128)

    # VMEM vector accumulator: elementwise add each step (no per-step XLU
    # reduce, no scalar SMEM read-modify-write).
    acc_ref[...] += loss

    @pl.when(j == pl.num_programs(1) - 1)
    def _():
        # one cross-sublane reduce per batch item -> lane-dense (1,1,128) partial
        out_ref[...] = jnp.sum(acc_ref[...], axis=0).reshape(1, 1, 128)


def focal_loss(output, target, *, gamma=GAMMA, ignore_index=IGNORE_INDEX,
               size_average=True):
    """output: (N, C, H, W) float logits; target: (N, H, W) int labels."""
    N, C, H, W = output.shape
    HW = H * W
    P = N * HW                                    # denominator for .mean()

    # ---- tiling: pixels lane-dense, 128-pixel "rows" on the sublane axis ----
    rows = _round_up(HW, 128) // 128
    # rows-per-tile cap: big tiles amortize per-step overhead, but keep the
    # double-buffered f32 logits tile well under the scoped VMEM limit
    # (2 * t_sub * 128 * C * 4 bytes), which also fits v7x's smaller VMEM.
    cap_rows = 64                                 # 8192 pixels / tile by default
    while cap_rows > 8 and 2 * cap_rows * 128 * C * 4 > (8 << 20):
        cap_rows //= 2
    if rows <= cap_rows:
        t_sub, rows_pad = rows, rows              # single pixel-tile per batch
    else:
        t_sub = cap_rows                          # multiple of 8
        rows_pad = _round_up(rows, t_sub)
    n_tiles = rows_pad // t_sub
    HW_pad = rows_pad * 128

    # ---- native-layout reshapes (no transpose); pad pixels if needed --------
    logits3 = output.reshape(N, C, HW)
    target2 = target.reshape(N, HW).astype(jnp.int32)
    if HW_pad != HW:
        logits3 = jnp.pad(logits3, ((0, 0), (0, 0), (0, HW_pad - HW)))
        target2 = jnp.pad(target2, ((0, 0), (0, HW_pad - HW)),
                          constant_values=ignore_index)   # padded pixels ignored
    logits4 = logits3.reshape(N, C, rows_pad, 128)
    target4 = target2.reshape(N, 1, rows_pad, 128)

    g = float(gamma)
    gamma_int = int(g) if (g.is_integer() and 0.0 <= g <= 8.0) else None

    kernel = functools.partial(
        _focal_loss_kernel,
        num_classes=C,
        gamma=g,
        gamma_int=gamma_int,
        ignore_index=ignore_index,
    )

    partials = pl.pallas_call(
        kernel,
        out_shape=jax.ShapeDtypeStruct((N, 1, 128), jnp.float32),
        grid_spec=pltpu.PrefetchScalarGridSpec(
            num_scalar_prefetch=0,
            grid=(N, n_tiles),
            in_specs=[
                pl.BlockSpec((1, C, t_sub, 128), lambda b, j: (b, 0, j, 0)),
                pl.BlockSpec((1, 1, t_sub, 128), lambda b, j: (b, 0, j, 0)),
            ],
            out_specs=pl.BlockSpec((1, 1, 128), lambda b, j: (b, 0, 0)),
            scratch_shapes=[pltpu.VMEM((t_sub, 128), jnp.float32)],
        ),
        compiler_params=pltpu.CompilerParams(
            dimension_semantics=("parallel", "arbitrary"),
        ),
    )(logits4, target4)

    # final tiny reduction in plain JAX (keeps grid axes parallelizable)
    loss_sum = jnp.sum(partials)
    if size_average:
        return loss_sum / jnp.float32(P)          # mean over ALL N*H*W pixels
    return loss_sum


def _focal_loss_ref(output, target, *, gamma=GAMMA, ignore_index=IGNORE_INDEX):
    N, C, H, W = output.shape
    x = jnp.transpose(output, (0, 2, 3, 1)).reshape(-1, C).astype(jnp.float32)
    t = target.reshape(-1).astype(jnp.int32)
    lse = jax.scipy.special.logsumexp(x, axis=-1)
    tgt = jnp.sum(jnp.where(jnp.arange(C)[None, :] == t[:, None], x, 0.0), -1)
    logpt = jnp.where(t != ignore_index, lse - tgt, 0.0)
    pt = jnp.exp(-logpt)
    return jnp.mean((1.0 - pt) ** gamma * logpt)


if __name__ == "__main__":
    key = jax.random.PRNGKey(0)
    k1, k2, k3 = jax.random.split(key, 3)

    N, C, H, W = 2, 4, 16, 16
    output = jax.random.normal(k1, (N, C, H, W), dtype=jnp.float32)
    target = jax.random.randint(k2, (N, H, W), 0, C, dtype=jnp.int32)
    # sprinkle some ignore_index pixels to exercise the masking path
    ignore_mask = jax.random.bernoulli(k3, 0.1, (N, H, W))
    target = jnp.where(ignore_mask, IGNORE_INDEX, target)

    loss = focal_loss(output, target)
    jax.block_until_ready(loss)

    ref = _focal_loss_ref(output, target)
    assert np.allclose(np.asarray(loss), np.asarray(ref), rtol=1e-5, atol=1e-6), (
        float(loss), float(ref))

    print("KERNEL_OK")
</pallas_src>

<mosaic_0001>
module attributes {stable_mosaic.version = 11 : i64} {
  func.func @_focal_loss_kernel(%arg0: i32, %arg1: i32, %arg2: memref<1x4x2x128xf32, #tpu.memory_space<vmem>>, %arg3: memref<1x1x2x128xi32, #tpu.memory_space<vmem>>, %arg4: memref<1x1x128xf32, #tpu.memory_space<vmem>>, %arg5: memref<2x128xf32, #tpu.memory_space<vmem>>) attributes {dimension_semantics = [#tpu.dimension_semantics<parallel>, #tpu.dimension_semantics<arbitrary>], iteration_bounds = array<i64: 2, 1>, scalar_prefetch = 0 : i64, scratch_operands = 1 : i64, tpu.core_type = #tpu.core_type<tc>, window_params = [{transform_indices = @transform_0, window_bounds = array<i64: 1, 4, 2, 128>}, {transform_indices = @transform_1, window_bounds = array<i64: 1, 1, 2, 128>}, {transform_indices = @transform_2, window_bounds = array<i64: 1, 1, 128>}]} {
    %c0_i32 = arith.constant 0 : i32
    %0 = arith.cmpi eq, %arg1, %c0_i32 : i32
    %1 = arith.extui %0 : i1 to i32
    %c0_i32_0 = arith.constant 0 : i32
    %2 = arith.cmpi ne, %1, %c0_i32_0 : i32
    scf.if %2 {
      %cst_21 = arith.constant 0.000000e+00 : f32
      %78 = vector.broadcast %cst_21 : f32 to vector<2x128xf32>
      %c0_22 = arith.constant 0 : index
      %c0_23 = arith.constant 0 : index
      %79 = vector.load %arg5[%c0_22, %c0_23] : memref<2x128xf32, #tpu.memory_space<vmem>>, vector<2x128xf32>
      tpu.vector_store %arg5[%c0_22, %c0_23], %78 {strides = array<i32>} : memref<2x128xf32, #tpu.memory_space<vmem>>, vector<2x128xf32>,
    } else {
    }
    %c0 = arith.constant 0 : index
    %c0_1 = arith.constant 0 : index
    %c0_2 = arith.constant 0 : index
    %c0_3 = arith.constant 0 : index
    %3 = vector.load %arg2[%c0, %c0_1, %c0_2, %c0_3] : memref<1x4x2x128xf32, #tpu.memory_space<vmem>>, vector<1x4x2x128xf32>
    %4 = vector.shape_cast %3 : vector<1x4x2x128xf32> to vector<4x2x128xf32>
    %c0_4 = arith.constant 0 : index
    %c0_5 = arith.constant 0 : index
    %c0_6 = arith.constant 0 : index
    %c0_7 = arith.constant 0 : index
    %5 = vector.load %arg3[%c0_4, %c0_5, %c0_6, %c0_7] : memref<1x1x2x128xi32, #tpu.memory_space<vmem>>, vector<1x1x2x128xi32>
    %6 = vector.shape_cast %5 : vector<1x1x2x128xi32> to vector<2x128xi32>
    %7 = vector.extract_strided_slice %4 {offsets = [0, 0, 0], sizes = [1, 2, 128], strides = [1, 1, 1]} : vector<4x2x128xf32> to vector<1x2x128xf32>
    %8 = vector.shape_cast %7 : vector<1x2x128xf32> to vector<2x128xf32>
    %9 = vector.extract_strided_slice %4 {offsets = [1, 0, 0], sizes = [1, 2, 128], strides = [1, 1, 1]} : vector<4x2x128xf32> to vector<1x2x128xf32>
    %10 = vector.shape_cast %9 : vector<1x2x128xf32> to vector<2x128xf32>
    %11 = arith.maximumf %8, %10 : vector<2x128xf32>
    %12 = vector.extract_strided_slice %4 {offsets = [2, 0, 0], sizes = [1, 2, 128], strides = [1, 1, 1]} : vector<4x2x128xf32> to vector<1x2x128xf32>
    %13 = vector.shape_cast %12 : vector<1x2x128xf32> to vector<2x128xf32>
    %14 = arith.maximumf %11, %13 : vector<2x128xf32>
    %15 = vector.extract_strided_slice %4 {offsets = [3, 0, 0], sizes = [1, 2, 128], strides = [1, 1, 1]} : vector<4x2x128xf32> to vector<1x2x128xf32>
    %16 = vector.shape_cast %15 : vector<1x2x128xf32> to vector<2x128xf32>
    %17 = arith.maximumf %14, %16 : vector<2x128xf32>
    %18 = vector.extract_strided_slice %4 {offsets = [0, 0, 0], sizes = [1, 2, 128], strides = [1, 1, 1]} : vector<4x2x128xf32> to vector<1x2x128xf32>
    %19 = vector.shape_cast %18 : vector<1x2x128xf32> to vector<2x128xf32>
    %20 = arith.subf %19, %17 : vector<2x128xf32>
    %21 = math.exp %20 : vector<2x128xf32>
    %c0_i32_8 = arith.constant 0 : i32
    %22 = vector.broadcast %c0_i32_8 : i32 to vector<2x128xi32>
    %23 = arith.cmpi eq, %6, %22 : vector<2x128xi32>
    %24 = vector.extract_strided_slice %4 {offsets = [0, 0, 0], sizes = [1, 2, 128], strides = [1, 1, 1]} : vector<4x2x128xf32> to vector<1x2x128xf32>
    %25 = vector.shape_cast %24 : vector<1x2x128xf32> to vector<2x128xf32>
    %cst = arith.constant 0.000000e+00 : f32
    %26 = vector.broadcast %cst : f32 to vector<2x128xf32>
    %27 = arith.select %23, %25, %26 : vector<2x128xi1>, vector<2x128xf32>
    %28 = vector.extract_strided_slice %4 {offsets = [1, 0, 0], sizes = [1, 2, 128], strides = [1, 1, 1]} : vector<4x2x128xf32> to vector<1x2x128xf32>
    %29 = vector.shape_cast %28 : vector<1x2x128xf32> to vector<2x128xf32>
    %30 = arith.subf %29, %17 : vector<2x128xf32>
    %31 = math.exp %30 : vector<2x128xf32>
    %32 = arith.addf %21, %31 : vector<2x128xf32>
    %c1_i32 = arith.constant 1 : i32
    %33 = vector.broadcast %c1_i32 : i32 to vector<2x128xi32>
    %34 = arith.cmpi eq, %6, %33 : vector<2x128xi32>
    %cst_9 = arith.constant 0.000000e+00 : f32
    %35 = vector.broadcast %cst_9 : f32 to vector<2x128xf32>
    %36 = arith.select %34, %29, %35 : vector<2x128xi1>, vector<2x128xf32>
    %37 = arith.addf %27, %36 : vector<2x128xf32>
    %38 = vector.extract_strided_slice %4 {offsets = [2, 0, 0], sizes = [1, 2, 128], strides = [1, 1, 1]} : vector<4x2x128xf32> to vector<1x2x128xf32>
    %39 = vector.shape_cast %38 : vector<1x2x128xf32> to vector<2x128xf32>
    %40 = arith.subf %39, %17 : vector<2x128xf32>
    %41 = math.exp %40 : vector<2x128xf32>
    %42 = arith.addf %32, %41 : vector<2x128xf32>
    %c2_i32 = arith.constant 2 : i32
    %43 = vector.broadcast %c2_i32 : i32 to vector<2x128xi32>
    %44 = arith.cmpi eq, %6, %43 : vector<2x128xi32>
    %cst_10 = arith.constant 0.000000e+00 : f32
    %45 = vector.broadcast %cst_10 : f32 to vector<2x128xf32>
    %46 = arith.select %44, %39, %45 : vector<2x128xi1>, vector<2x128xf32>
    %47 = arith.addf %37, %46 : vector<2x128xf32>
    %48 = vector.extract_strided_slice %4 {offsets = [3, 0, 0], sizes = [1, 2, 128], strides = [1, 1, 1]} : vector<4x2x128xf32> to vector<1x2x128xf32>
    %49 = vector.shape_cast %48 : vector<1x2x128xf32> to vector<2x128xf32>
    %50 = arith.subf %49, %17 : vector<2x128xf32>
    %51 = math.exp %50 : vector<2x128xf32>
    %52 = arith.addf %42, %51 : vector<2x128xf32>
    %c3_i32 = arith.constant 3 : i32
    %53 = vector.broadcast %c3_i32 : i32 to vector<2x128xi32>
    %54 = arith.cmpi eq, %6, %53 : vector<2x128xi32>
    %cst_11 = arith.constant 0.000000e+00 : f32
    %55 = vector.broadcast %cst_11 : f32 to vector<2x128xf32>
    %56 = arith.select %54, %49, %55 : vector<2x128xi1>, vector<2x128xf32>
    %57 = arith.addf %47, %56 : vector<2x128xf32>
    %58 = math.log %52 : vector<2x128xf32>
    %59 = arith.addf %17, %58 : vector<2x128xf32>
    %60 = arith.subf %59, %57 : vector<2x128xf32>
    %c255_i32 = arith.constant 255 : i32
    %61 = vector.broadcast %c255_i32 : i32 to vector<2x128xi32>
    %62 = arith.cmpi ne, %6, %61 : vector<2x128xi32>
    %cst_12 = arith.constant 0.000000e+00 : f32
    %63 = vector.broadcast %cst_12 : f32 to vector<2x128xf32>
    %64 = arith.select %62, %60, %63 : vector<2x128xi1>, vector<2x128xf32>
    %cst_13 = arith.constant 0.000000e+00 : f32
    %65 = vector.broadcast %cst_13 : f32 to vector<2x128xf32>
    %66 = arith.subf %65, %64 : vector<2x128xf32>
    %67 = math.exp %66 : vector<2x128xf32>
    %cst_14 = arith.constant 1.000000e+00 : f32
    %68 = vector.broadcast %cst_14 : f32 to vector<2x128xf32>
    %69 = arith.subf %68, %67 : vector<2x128xf32>
    %70 = arith.mulf %69, %69 : vector<2x128xf32>
    %71 = arith.mulf %70, %64 : vector<2x128xf32>
    %c0_15 = arith.constant 0 : index
    %c0_16 = arith.constant 0 : index
    %72 = vector.load %arg5[%c0_15, %c0_16] : memref<2x128xf32, #tpu.memory_space<vmem>>, vector<2x128xf32>
    %73 = arith.addf %72, %71 : vector<2x128xf32>
    %c0_17 = arith.constant 0 : index
    %c0_18 = arith.constant 0 : index
    %74 = vector.load %arg5[%c0_17, %c0_18] : memref<2x128xf32, #tpu.memory_space<vmem>>, vector<2x128xf32>
    tpu.vector_store %arg5[%c0_17, %c0_18], %73 {strides = array<i32>} : memref<2x128xf32, #tpu.memory_space<vmem>>, vector<2x128xf32>,
    %c0_i32_19 = arith.constant 0 : i32
    %75 = arith.cmpi eq, %arg1, %c0_i32_19 : i32
    %76 = arith.extui %75 : i1 to i32
    %c0_i32_20 = arith.constant 0 : i32
    %77 = arith.cmpi ne, %76, %c0_i32_20 : i32
    scf.if %77 {
      %c0_21 = arith.constant 0 : index
      %c0_22 = arith.constant 0 : index
      %78 = vector.load %arg5[%c0_21, %c0_22] : memref<2x128xf32, #tpu.memory_space<vmem>>, vector<2x128xf32>
      %cst_23 = arith.constant dense<0.000000e+00> : vector<128xf32>
      %79 = vector.multi_reduction <add>, %78, %cst_23 [0] : vector<2x128xf32> to vector<128xf32>
      %80 = vector.shape_cast %79 : vector<128xf32> to vector<1x1x128xf32>
      %c0_24 = arith.constant 0 : index
      %c0_25 = arith.constant 0 : index
      %c0_26 = arith.constant 0 : index
      %81 = vector.load %arg4[%c0_24, %c0_25, %c0_26] : memref<1x1x128xf32, #tpu.memory_space<vmem>>, vector<1x1x128xf32>
      tpu.vector_store %arg4[%c0_24, %c0_25, %c0_26], %80 {strides = array<i32>} : memref<1x1x128xf32, #tpu.memory_space<vmem>>, vector<1x1x128xf32>,
    } else {
    }
    return
  }
  func.func @transform_0(%arg0: i32, %arg1: i32) -> (i32, i32, i32, i32) {
    %c0_i32 = arith.constant 0 : i32
    %c0_i32_0 = arith.constant 0 : i32
    %c0_i32_1 = arith.constant 0 : i32
    return %arg0, %c0_i32, %arg1, %c0_i32_0 : i32, i32, i32, i32
  }
  func.func @transform_1(%arg0: i32, %arg1: i32) -> (i32, i32, i32, i32) {
    %c0_i32 = arith.constant 0 : i32
    %c0_i32_0 = arith.constant 0 : i32
    %c0_i32_1 = arith.constant 0 : i32
    return %arg0, %c0_i32, %arg1, %c0_i32_0 : i32, i32, i32, i32
  }
  func.func @transform_2(%arg0: i32, %arg1: i32) -> (i32, i32, i32) {
    %c0_i32 = arith.constant 0 : i32
    %c0_i32_0 = arith.constant 0 : i32
    %c0_i32_1 = arith.constant 0 : i32
    return %arg0, %c0_i32, %c0_i32_0 : i32, i32, i32
  }
}

</mosaic_0001>

<bundles_post_ra>
// kernel: tpu_custom_call.1
= control target key start
LH: loop header
LB: loop body
LE: loop exit
PB: predicated region body
PF: predicated region fallthrough
CT: control target
= control target key end

     0   :  { %7 = vsyncpa [#allocation4], 0  ;;  %s802_s0 = inlined_call_operand.hbm [shape: f32[2,4,2,128], index: 0, kind: input, shape index: {}]   ;;  %s803_s1 = inlined_call_operand.hbm [shape: s32[2,1,2,128], index: 1, kind: input, shape index: {}]   ;;  %s804_s2 = inlined_call_operand.hbm [shape: f32[2,1,128], index: 2, kind: output, shape index: {}]  }
   0x1   :  { %9 = vsyncpa [#allocation4 + $0x1], 0 }
   0x2   :  { %10 = vsyncpa [#allocation7], 0 }
   0x3   :  { %12 = vsyncpa [#allocation7 + $0x1], 0 }
   0x4   :  { %13 = vsyncpa [#allocation5], 0 }
   0x5   :  { %15 = vsyncpa [#allocation5 + $0x1], 0  ;;  %s663_s9 = smov 0   ;;  %s665_s10 = smov 0  }
   0x6   :  { %s667_s11 = smov 0   ;;  %s669_s12 = smov 0  }
   0x7   :  { %s671_s13 = smov 0   ;;  %s673_s14 = smov 0  }
   0x8 LB: > { %s400_s15 = sadd.s32 4294967295, %s643_s14   ;;  %s401_s16 = sadd.s32 4294967294, %s643_s14   ;;  %s643_s14 = sphi %s673_s14, %s21_s14   ;;  %s639_s13 = sphi %s671_s13, %s814_s13   ;;  %s635_s12 = sphi %s669_s12, %s813_s12   ;;  %s631_s11 = sphi %s667_s11, %s812_s11   ;;  %s627_s10 = sphi %s665_s10, %s811_s10   ;;  %s623_s9 = sphi %s663_s9, %s810_s9  }
   0x9   : > { %s33_s17 = sadd.s32 1, %s639_s13  ;;  %s42_s18 = sadd.s32 1, %s631_s11 }
   0xa   : > { %p35_p0 = scmp.ge.s32.totalorder %s33_s17, 2  ;;  %p49_p1 = scmp.ne.s32.totalorder %s631_s11, %s627_s10 }
   0xb   : > { %p50_p2 = scmp.eq.s32.totalorder %s643_s14, 0  ;;  %p55_p3 = scmp.ne.s32.totalorder %s627_s10, %s623_s9 }
   0xc   : > { %s816_s17 = smov (%p35_p0, %s33_s17), 0  ;;  %p56_p5 = scmp.eq.s32.totalorder %s400_s15, 0 }
   0xd   : > { %p704_p4 = por %p50_p2, %p49_p1  ;;  %s37_s20 = ssub.s32 %s639_s13, %s816_s17 }
   0xe   : > { %p107_p6 = scmp.eq.s32.totalorder %s400_s15, 1  ;;  %p40_p7 = scmp.eq.s32.totalorder %s37_s20, 0 }
   0xf   : > { %p710_p8 = por %p56_p5, %p55_p3  ;;  %p113_p10 = scmp.eq.s32.totalorder %s401_s16, 1 }
  0x10   : > { %p714_p9 = por %p107_p6, %p49_p1  ;;  %p403_p12 = scmp.ge.s32.totalorder %s643_s14, 2 }
  0x11   : > { %s719_s23 = scalar_select %p40_p7, %s631_s11, %s42_s18  }
  0x12   : > { %p721_p11 = por %p113_p10, %p55_p3  ;;  %p432_p13 = scmp.lt.s32.totalorder %s643_s14, 2 }
  0x13   : > { %s133_s25 = sand.u32 1, %s631_s11   ;;  %s414_s27 = sshll.u32 %s639_s13, 3 }
  0x14   : > { %s404_s26 = sshll.u32 %s133_s25, 3  ;;  %s143_s30 = scalar_lea.hbm %s802_s0, %s414_s27 }
  0x15   : > { %s137_s3 = scalar_lea.vmem [#allocation3], %s404_s26  ;;  %s144_s5 = sshll.u32 %s143_s30, 4  ;;  %s145_s5 = int_to_ptr.hbm [resolvable:$true] %s144_s5 }
  0x16   : > { %s146_s4 = sshll.u32 %s137_s3, 4  ;;  %p734_p0 = pnand %p432_p13, %p704_p4  ;;  %s147_s4 = int_to_ptr.vmem [resolvable:$true] %s146_s4 }
  0x17   : > { %p409_p1 = scmp.ge.s32.totalorder %s643_s14, 1  ;;  %s134_s7 = scalar_lea.sflag [#allocation4], %s133_s25 }
  0x18   : > { %s645_s8 = smov 32   ;;  %s646_s15 = smov 2  }
  0x19   : > { %424 = dma.hbm_to_vmem [thread:$0]  (!%p734_p0), %s145_s5, 128, %s147_s4, %s134_s7, %s645_s8, %s645_s8, %s646_s15  }
  0x1a   : > { %p174_p2 = scmp.lt.s32.totalorder %s643_s14, 3  ;;  %s407_s16 = sshll.u32 %s133_s25, 1 }
  0x1b   : > { %s408_s18 = sshll.u32 %s639_s13, 1  ;;  %s160_s27 = scalar_lea.vmem [#allocation6], %s407_s16 }
  0x1c   : > { %p175_p3 = pnand %p409_p1, %p174_p2  ;;  %s165_s19 = scalar_lea.hbm %s803_s1, %s408_s18 }
  0x1d   : > { %s169_s28 = sshll.u32 %s160_s27, 4  ;;  %s167_s29 = sshll.u32 %s165_s19, 4  ;;  %s170_s28 = int_to_ptr.vmem [resolvable:$true] %s169_s28  ;;  %s168_s29 = int_to_ptr.hbm [resolvable:$true] %s167_s29 }
  0x1e   : > { %s157_s30 = scalar_lea.sflag [#allocation7], %s133_s25  ;;  %178 = sbr.rel (%p175_p3) target bundleno = 121 (0x79), region = 28 }
  0x1f   : > { %427 = dma.hbm_to_vmem [thread:$0]  (!%p734_p0), %s168_s29, 32, %s170_s28, %s157_s30  }
  0x20   : > { %s749_s3 = sand.u32 (!%p175_p3), 1, %s627_s10  }
  0x21   : > { %s410_s4 = sshll.u32 (!%p175_p3), %s749_s3, 3  ;;  %s181_s5 = scalar_lea.sflag (!%p175_p3), [#allocation4], %s749_s3 }
  0x22   : > { %s184_s7 = scalar_lea.vmem (!%p175_p3), [#allocation3], %s410_s4 }
  0x23   : > { %610 = dma.done.wait (%p710_p8), %s181_s5, 128  }
  0x24   : > { %612 = vsyncadd (%p710_p8), %s181_s5, 4294967168  ;;  %s411_s25 = sshll.u32 %s749_s3, 1  ;;  %s191_s6 = scalar_lea.sflag [#allocation7], %s749_s3 }
  0x25   : > { %s194_s8 = scalar_lea.vmem [#allocation6], %s411_s25 }
  0x26   : > { %614 = dma.done.wait (%p710_p8), %s191_s6, 32  }
  0x27   : > { %616 = vsyncadd (%p710_p8), %s191_s6, 4294967264  ;;  %v647_v0 = vmov 0.0   ;;  %v225_v1 = vld [vmem:[%s184_s7] sm:$0x3]  ;;  %v226_v2 = vld [vmem:[%s184_s7 + $0x2] sm:$0x3]  ;;  %s296_s16 = scalar_lea.hbm %s804_s2, %s635_s12 }
  0x28   : > { %224 = vst [vmem:[#allocation2] sm:$0x3] %v647_v0  ;;  %v227_v3 = vld [vmem:[%s184_s7 + $0x4] sm:$0x3]  ;;  %v230_v4 = vmax.f32 %v225_v1, %v226_v2  ;;  %v228_v5 = vld [vmem:[%s184_s7 + $0x6] sm:$0x3] }
  0x29   : > { %v229_v16 = vld [vmem:[%s194_s8] sm:$0x3]  ;;  %vm278_vm5 = vcmask 1041408   ;;  %s219_s18 = scalar_lea.vmem [#allocation8], %s749_s3  ;;  %s300_s26 = sshll.u32 %s296_s16, 4  ;;  %s301_s26 = int_to_ptr.hbm [resolvable:$true] %s300_s26 }
  0x2a   : > { %v231_v6 = vmax.f32 %v230_v4, %v227_v3  ;;  %vm236_vm0 = vcmp.eq.s32.totalorder %v229_v16, 0  ;;  %vm242_vm1 = vcmp.eq.s32.totalorder %v229_v16, 1  ;;  %vm249_vm2 = vcmp.eq.s32.totalorder %v229_v16, 2  ;;  %s298_s20 = sshll.u32 %s219_s18, 4  ;;  %s288_s19 = scalar_lea.sflag [#allocation5], %s749_s3  ;;  %s299_s20 = int_to_ptr.vmem [resolvable:$true] %s298_s20 }
  0x2b   : > { %v237_v22 = vsel %vm236_vm0, %v225_v1, 0.0  ;;  %v243_v23 = vsel %vm242_vm1, %v226_v2, 0.0  ;;  %v250_v27 = vsel %vm249_vm2, %v227_v3, 0.0  ;;  %vm256_vm3 = vcmp.eq.s32.totalorder %v229_v16, 3  ;;  %s571_s27 = sshra.s32 %s301_s26, 4  ;;  %s577_s12 = scalar_lea.hbm %s804_s2, 2  ;;  %s572_s27 = int_to_ptr.hbm [resolvable:$true] %s571_s27 }
  0x2c   : > { %v232_v7 = vmax.f32 %v231_v6, %v228_v5  ;;  %v244_v26 = vadd.f32 %v243_v23, %v237_v22  ;;  %v257_v29 = vsel %vm256_vm3, %v228_v5, 0.0  ;;  %vm263_vm4 = vcmp.ne.s32.totalorder %v229_v16, 255  ;;  %s573_s28 = scalar_lea.hbm %s572_s27, 1  ;;  %p578_p7 = scmp.lt.s32.totalorder %s572_s27, %s804_s2 }
  0x2d   : > { %p574_p4 = scmp.ne.s32.totalorder %s572_s27, %s573_s28  ;;  %p579_p8 = scmp.lt.s32.totalorder %s577_s12, %s573_s28 }
  0x2e   : > { %v233_v8 = vsub.f32 %v225_v1, %v232_v7  ;;  %v238_v9 = vsub.f32 %v226_v2, %v232_v7  ;;  %v245_v10 = vsub.f32 %v227_v3, %v232_v7  ;;  %v252_v11 = vsub.f32 %v228_v5, %v232_v7 }
  0x2f   : > { %v251_v28 = vadd.f32 %v250_v27, %v244_v26  ;;  %v271_v41 = vld [vmem:[#allocation2] sm:$0x3]  ;;  %p575_p5 = pnand %p574_p4, %p714_p9  ;;  %p580_p10 = por %p579_p8, %p578_p7 }
  0x30   : > { %v234_v12 = vmul.f32 1.442695, %v233_v8  ;;  %v239_v13 = vmul.f32 1.442695, %v238_v9  ;;  %v246_v14 = vmul.f32 1.442695, %v245_v10 }
  0x31   : > { %v253_v15 = vmul.f32 1.442695, %v252_v11  ;;  %v258_v31 = vadd.f32 %v257_v29, %v251_v28  ;;  %p576_p6 = pneg %p575_p5 }
  0x32   : > { %485 = vpow2.f32 %v234_v12 }
  0x33   : > { %487 = vpow2.f32 %v239_v13  ;;  %p581_p13 = pnand %p580_p10, %p576_p6 }
  0x34   : > { %489 = vpow2.f32 %v246_v14 }
  0x35   : > { %491 = vpow2.f32 %v253_v15 }
  0x38   : > { %v486_v17 = vpop.eup %485 }
  0x39   : > { %v488_v18 = vpop.eup %487 }
  0x3a   : > { %v490_v19 = vpop.eup %489  ;;  %v241_v20 = vadd.f32 %v488_v18, %v486_v17 }
  0x3b   : > { %v492_v21 = vpop.eup %491 }
  0x3c   : > { %v248_v24 = vadd.f32 %v490_v19, %v241_v20 }
  0x3e   : > { %v255_v25 = vadd.f32 %v492_v21, %v248_v24 }
  0x40   : > { %493 = vlog2.f32 %v255_v25 }
  0x46   : > { %v494_v30 = vpop.eup %493 }
  0x47   : > { %v260_v32 = vmul.f32 0.6931472, %v494_v30 }
  0x49   : > { %v261_v33 = vadd.f32 %v260_v32, %v232_v7 }
  0x4b   : > { %v262_v34 = vsub.f32 %v261_v33, %v258_v31 }
  0x4d   : > { %v264_v35 = vsel %vm263_vm4, %v262_v34, 0.0 }
  0x4e   : > { %v265_v36 = vsub.f32 0.0, %v264_v35 }
  0x50   : > { %v266_v37 = vmul.f32 1.442695, %v265_v36 }
  0x52   : > { %495 = vpow2.f32 %v266_v37 }
  0x58   : > { %v496_v38 = vpop.eup %495 }
  0x59   : > { %v268_v39 = vsub.f32 1.0, %v496_v38 }
  0x5b   : > { %v269_v40 = vmul.f32 %v268_v39, %v268_v39 }
  0x5d   : > { %v270_v42 = vmul.f32 %v269_v40, %v264_v35 }
  0x5f   : > { %v272_v43 = vadd.f32 %v271_v41, %v270_v42 }
  0x61   : > { %273 = vst [vmem:[#allocation2] sm:$0x3] %v272_v43 }
  0x68   : > { %v277_v44 = vld [vmem:[#allocation2] sm:$0x3] }
  0x69   : > { %v279_v45 = vsel %vm278_vm5, %v277_v44, 0.0 }
  0x6a   : > { %v280_v46 = vrot.slane %v279_v45, 4 }
  0x6c   : > { %v281_v47 = vadd.f32 %v280_v46, %v279_v45 }
  0x6e   : > { %v282_v48 = vrot.slane %v281_v47, 2 }
  0x70   : > { %v283_v49 = vadd.f32 %v282_v48, %v281_v47 }
  0x72   : > { %v284_v50 = vrot.slane %v283_v49, 1 }
  0x74   : > { %v285_v51 = vadd.f32 %v284_v50, %v283_v49 }
  0x76   : > { %286 = vst [vmem:[%s219_s18] sm:$0x1] %v285_v51 }
  0x77   : > { %584 = shalt.err (!%p581_p13)
}
  0x78   : > { %419 = dma.vmem_to_hbm [thread:$0]  (%p714_p9), %s299_s20, 16, %s301_s26, %s288_s19  }
  0x79 PF: > { %s312_s3 = sand.u32 1, %s623_s9   ;;  %p429_p0 = pnand %p403_p12, %p721_p11 }
  0x7a   : > { %s313_s7 = scalar_lea.sflag [#allocation5], %s312_s3 }
  0x7b   : > { %p430_p1 = pneg %p429_p0 }
  0x7d   : > { %618 = dma.done.wait (%p430_p1), %s313_s7, 16  }
  0x7e   : > { %620 = vsyncadd (%p430_p1), %s313_s7, 4294967280  ;;  %s21_s14 = sadd.s32 1, %s643_s14   ;;  %s810_s9 = smov %s627_s10 }
  0x7f   : > { %p18_p2 = scmp.ge.s32.totalorder %s21_s14, 4   ;;  %s811_s10 = smov %s631_s11 }
  0x80   : > { %s812_s11 = smov %s719_s23  ;;  %s813_s12 = smov %s639_s13 }
  0x81   : > { %s814_s13 = smov %s816_s17  ;;  %20 = sbr.rel (!%p18_p2) target bundleno = 8 (0x8), region = 94 }
  0x86   :  { %318 = vsyncpa [#allocation4], 1 }
  0x87   :  { %320 = vsyncpa [#allocation4 + $0x1], 1 }
  0x88   :  { %321 = vsyncpa [#allocation7], 1 }
  0x89   :  { %323 = vsyncpa [#allocation7 + $0x1], 1 }
  0x8a   :  { %324 = vsyncpa [#allocation5], 1 }
  0x8b   :  { %326 = vsyncpa [#allocation5 + $0x1], 1 }

</bundles_post_ra>
